<compile_context>
chip_gen: v7x
topology: tpu7x:2x2x1
jax: 0.10.0
libtpu: 0.0.40
codegen_flags: <defaults>
</compile_context>

<pallas_src>
import functools

import jax
import jax.numpy as jnp
import numpy as np
from jax.experimental import pallas as pl
from jax.experimental.pallas import tpu as pltpu


def _se_kernel(x_ref, w1_ref, w2_ref, w3_ref, o_ref, *, inv_hw):
    """One batch element per grid step.

    x_ref : (1, C, HW)   input slab (unpadded spatial axis)
    w1_ref: (C//r, C)    fc1 weight (PyTorch Linear layout: (out, in))
    w2_ref: (C, C//r)    fc2 weight
    w3_ref: (C, C)       semantic fc weight
    o_ref : (1, C, HW)   output slab
    """
    x = x_ref[0]                                                   # (C, HW), input dtype

    # --- single traversal of the slab: spatial sum (f32 accumulate) and
    # --- per-channel max.  No masking needed: the lane dim is unpadded.
    ssum = jnp.sum(x.astype(jnp.float32), axis=-1, keepdims=True)  # (C, 1) f32
    xmax = jnp.max(x, axis=-1, keepdims=True).astype(jnp.float32)  # (C, 1) f32
    mean = ssum * inv_hw

    # --- excitation MLP: FC1 -> ReLU -> FC2 -> sigmoid.
    # Weights stay in their stored dtype (bf16 x bf16 -> f32 is MXU-native);
    # only the tiny (C,1) activations are cast to match.
    w1 = w1_ref[...]
    w2 = w2_ref[...]
    w3 = w3_ref[...]
    h = jnp.dot(w1, mean.astype(w1.dtype), preferred_element_type=jnp.float32)  # (C//r,1)
    h = jnp.maximum(h, 0.0)
    y = jax.nn.sigmoid(
        jnp.dot(w2, h.astype(w2.dtype), preferred_element_type=jnp.float32))    # (C,1)

    # --- semantic gate.  sigmoid gate y > 0  =>  max(x*y) == y * max(x).
    z_in = y * xmax                                                              # (C,1) f32
    z = jax.nn.sigmoid(
        jnp.dot(w3, z_in.astype(w3.dtype), preferred_element_type=jnp.float32))  # (C,1)

    # --- fused scale: out = x * y * z (single broadcast gate, hoisted).
    gate = (y * z).astype(x.dtype)                                              # (C,1)
    o_ref[0] = x * gate


def _round_up(a, m):
    return ((a + m - 1) // m) * m


def _spec(shape, index_map, mode):
    if mode is None:
        return pl.BlockSpec(shape, index_map)
    return pl.BlockSpec(shape, index_map, pipeline_mode=mode)


@jax.jit
def se_attention_pallas(x, w1, w2, w3):
    """x: (B, C, H, W); w1: (C//r, C); w2: (C, C//r); w3: (C, C)."""
    B, C, H, W = x.shape
    hw = H * W
    Cr = w1.shape[0]

    xf = x.reshape(B, C, hw)   # no padding: blocks are full-extent on the last dim

    kernel = functools.partial(_se_kernel, inv_hw=1.0 / hw)

    # ---- VMEM budget (sizes padded to the (8, 128) tile the compiler uses).
    blk_bytes = _round_up(C, 8) * _round_up(hw, 128) * jnp.dtype(x.dtype).itemsize
    w_bytes = (
        _round_up(Cr, 8) * _round_up(C, 128) * jnp.dtype(w1.dtype).itemsize
        + _round_up(C, 8) * _round_up(Cr, 128) * jnp.dtype(w2.dtype).itemsize
        + _round_up(C, 8) * _round_up(C, 128) * jnp.dtype(w3.dtype).itemsize
    )
    headroom = 4 << 20   # Mosaic internal scratch, DMA descriptors, semaphores.

    # Physical VMEM: 128 MiB on v5e/v6e, 64 MiB per TensorCore on v7x.
    try:
        vmem_cap = int(getattr(pltpu.get_tpu_info(), "vmem_capacity_bytes", 64 << 20))
    except Exception:
        vmem_cap = 64 << 20   # conservative (v7x) fallback
    vmem_usable = vmem_cap - (8 << 20)

    # Default: double-buffered in/out slabs (DMA/compute overlap), single-
    # buffered resident weights (constant index maps -> never re-fetched).
    slab_bufs = 2
    need = 2 * slab_bufs * blk_bytes + w_bytes + headroom
    if need > vmem_usable:
        # Large-slab fallback (mainly v7x): halve slab VMEM by dropping the
        # double buffering; each step is long and mem-bound so the lost
        # overlap is far cheaper than a VMEM OOM or tiny forced tiles.
        slab_bufs = 1
        need = 2 * slab_bufs * blk_bytes + w_bytes + headroom
    # TODO(synk): if even single-buffered slabs exceed VMEM, switch to a
    # two-pass spatially-tiled structure (reduce kernel -> gate -> scale kernel).
    # TODO(synk): for B=1 on v7x, add a second "parallel" grid axis over spatial
    # halves (exchange the tiny (C,1) partial sum/max) so both TensorCores work.

    slab_mode = pl.Buffered(1) if slab_bufs == 1 else None
    weight_mode = pl.Buffered(1)

    # Always pass an explicit limit (v5e default is 16 MiB), capped to physical.
    vmem_limit = int(min(max(need, 32 << 20), vmem_usable))

    out = pl.pallas_call(
        kernel,
        out_shape=jax.ShapeDtypeStruct((B, C, hw), x.dtype),
        grid=(B,),
        in_specs=[
            _spec((1, C, hw), lambda b: (b, 0, 0), slab_mode),
            # constant index_maps -> weights stay VMEM-resident across the grid
            _spec((Cr, C), lambda b: (0, 0), weight_mode),
            _spec((C, Cr), lambda b: (0, 0), weight_mode),
            _spec((C, C), lambda b: (0, 0), weight_mode),
        ],
        out_specs=_spec((1, C, hw), lambda b: (b, 0, 0), slab_mode),
        compiler_params=pltpu.CompilerParams(
            dimension_semantics=("parallel",),
            vmem_limit_bytes=vmem_limit,
        ),
    )(xf, w1, w2, w3)

    return out.reshape(B, C, H, W)


def se_attention_ref(x, w1, w2, w3):
    """Pure-JAX reference matching the PyTorch forward exactly."""
    y = jnp.mean(x, axis=(2, 3))                        # (B, C)  avg pool
    y = jnp.maximum(y @ w1.T, 0.0)                      # FC1 + ReLU
    y = jax.nn.sigmoid(y @ w2.T)                        # FC2 + sigmoid
    x = x * y[:, :, None, None]
    z = jnp.max(x, axis=(2, 3))                         # max pool of scaled x
    z = jax.nn.sigmoid(z @ w3.T)                        # semantic FC + sigmoid
    return x * z[:, :, None, None]


if __name__ == "__main__":
    key = jax.random.PRNGKey(0)
    k1, k2, k3, k4, k5, k6 = jax.random.split(key, 6)

    B, C, r = 2, 128, 16
    Cr = C // r
    w1 = jax.random.normal(k2, (Cr, C), dtype=jnp.float32) * 0.05
    w2 = jax.random.normal(k3, (C, Cr), dtype=jnp.float32) * 0.05
    w3 = jax.random.normal(k4, (C, C), dtype=jnp.float32) * 0.05

    # Case 1: lane-aligned spatial size (16*16 = 256).
    x = jax.random.normal(k1, (B, C, 16, 16), dtype=jnp.float32)
    out = jax.block_until_ready(se_attention_pallas(x, w1, w2, w3))
    ref = se_attention_ref(x, w1, w2, w3)
    np.testing.assert_allclose(np.asarray(out), np.asarray(ref),
                               rtol=1e-3, atol=1e-3)

    # Case 2: ragged spatial size (12*12 = 144), handled without any padding.
    x2 = jax.random.normal(k5, (B, C, 12, 12), dtype=jnp.float32)
    out2 = jax.block_until_ready(se_attention_pallas(x2, w1, w2, w3))
    ref2 = se_attention_ref(x2, w1, w2, w3)
    np.testing.assert_allclose(np.asarray(out2), np.asarray(ref2),
                               rtol=1e-3, atol=1e-3)

    # Case 3: bf16 end-to-end (halves HBM traffic; gate math stays f32).
    xb = jax.random.normal(k6, (B, C, 12, 12), dtype=jnp.bfloat16)
    w1b, w2b, w3b = (w.astype(jnp.bfloat16) for w in (w1, w2, w3))
    out3 = jax.block_until_ready(se_attention_pallas(xb, w1b, w2b, w3b))
    ref3 = se_attention_ref(xb.astype(jnp.float32), w1b.astype(jnp.float32),
                            w2b.astype(jnp.float32), w3b.astype(jnp.float32))
    np.testing.assert_allclose(np.asarray(out3.astype(jnp.float32)),
                               np.asarray(ref3), rtol=2e-2, atol=2e-2)

    print("KERNEL_OK")
</pallas_src>

<mosaic_0001>
module attributes {stable_mosaic.version = 11 : i64} {
  func.func @_se_kernel(%arg0: i32, %arg1: memref<1x128x256xf32, #tpu.memory_space<vmem>>, %arg2: memref<8x128xf32, #tpu.memory_space<vmem>>, %arg3: memref<128x8xf32, #tpu.memory_space<vmem>>, %arg4: memref<128x128xf32, #tpu.memory_space<vmem>>, %arg5: memref<1x128x256xf32, #tpu.memory_space<vmem>>) attributes {dimension_semantics = [#tpu.dimension_semantics<parallel>], iteration_bounds = array<i64: 2>, scalar_prefetch = 0 : i64, scratch_operands = 0 : i64, tpu.core_type = #tpu.core_type<tc>, window_params = [{transform_indices = @transform_0, window_bounds = array<i64: 1, 128, 256>}, {pipeline_mode = #tpu.pipeline_mode<synchronous>, transform_indices = @transform_1, window_bounds = array<i64: 8, 128>}, {pipeline_mode = #tpu.pipeline_mode<synchronous>, transform_indices = @transform_2, window_bounds = array<i64: 128, 8>}, {pipeline_mode = #tpu.pipeline_mode<synchronous>, transform_indices = @transform_3, window_bounds = array<i64: 128, 128>}, {transform_indices = @transform_4, window_bounds = array<i64: 1, 128, 256>}]} {
    %c0 = arith.constant 0 : index
    %c0_0 = arith.constant 0 : index
    %c0_1 = arith.constant 0 : index
    %0 = vector.load %arg1[%c0, %c0_0, %c0_1] : memref<1x128x256xf32, #tpu.memory_space<vmem>>, vector<1x128x256xf32>
    %1 = vector.shape_cast %0 : vector<1x128x256xf32> to vector<128x256xf32>
    %cst = arith.constant dense<0.000000e+00> : vector<128xf32>
    %2 = vector.multi_reduction <add>, %1, %cst [1] : vector<128x256xf32> to vector<128xf32>
    %3 = vector.shape_cast %2 : vector<128xf32> to vector<128x1xf32>
    %cst_2 = arith.constant dense<0xFF800000> : vector<128xf32>
    %4 = vector.multi_reduction <maximumf>, %1, %cst_2 [1] : vector<128x256xf32> to vector<128xf32>
    %5 = vector.shape_cast %4 : vector<128xf32> to vector<128x1xf32>
    %cst_3 = arith.constant 3.906250e-03 : f32
    %6 = vector.broadcast %cst_3 : f32 to vector<128x1xf32>
    %7 = arith.mulf %3, %6 : vector<128x1xf32>
    %c0_4 = arith.constant 0 : index
    %c0_5 = arith.constant 0 : index
    %8 = vector.load %arg2[%c0_4, %c0_5] : memref<8x128xf32, #tpu.memory_space<vmem>>, vector<8x128xf32>
    %c0_6 = arith.constant 0 : index
    %c0_7 = arith.constant 0 : index
    %9 = vector.load %arg3[%c0_6, %c0_7] : memref<128x8xf32, #tpu.memory_space<vmem>>, vector<128x8xf32>
    %c0_8 = arith.constant 0 : index
    %c0_9 = arith.constant 0 : index
    %10 = vector.load %arg4[%c0_8, %c0_9] : memref<128x128xf32, #tpu.memory_space<vmem>>, vector<128x128xf32>
    %cst_10 = arith.constant dense<0.000000e+00> : vector<8x1xf32>
    %11 = tpu.matmul %8, %7, %cst_10 {dimension_numbers = #tpu.dot_dimension_numbers<[1], [0], [0], [1], [0, 0, 1, 1], [], []>} : vector<8x128xf32>, vector<128x1xf32>, vector<8x1xf32> -> vector<8x1xf32>
    %cst_11 = arith.constant 0.000000e+00 : f32
    %12 = vector.broadcast %cst_11 : f32 to vector<8x1xf32>
    %13 = arith.maximumf %11, %12 : vector<8x1xf32>
    %cst_12 = arith.constant dense<0.000000e+00> : vector<128x1xf32>
    %14 = tpu.matmul %9, %13, %cst_12 {dimension_numbers = #tpu.dot_dimension_numbers<[1], [0], [0], [1], [0, 0, 1, 1], [], []>} : vector<128x8xf32>, vector<8x1xf32>, vector<128x1xf32> -> vector<128x1xf32>
    %15 = arith.negf %14 : vector<128x1xf32>
    %16 = math.exp %15 : vector<128x1xf32>
    %cst_13 = arith.constant 1.000000e+00 : f32
    %17 = vector.broadcast %cst_13 : f32 to vector<128x1xf32>
    %18 = arith.addf %17, %16 : vector<128x1xf32>
    %19 = arith.divf %17, %18 : vector<128x1xf32>
    %20 = arith.mulf %19, %5 : vector<128x1xf32>
    %cst_14 = arith.constant dense<0.000000e+00> : vector<128x1xf32>
    %21 = tpu.matmul %10, %20, %cst_14 {dimension_numbers = #tpu.dot_dimension_numbers<[1], [0], [0], [1], [0, 0, 1, 1], [], []>} : vector<128x128xf32>, vector<128x1xf32>, vector<128x1xf32> -> vector<128x1xf32>
    %22 = arith.negf %21 : vector<128x1xf32>
    %23 = math.exp %22 : vector<128x1xf32>
    %cst_15 = arith.constant 1.000000e+00 : f32
    %24 = vector.broadcast %cst_15 : f32 to vector<128x1xf32>
    %25 = arith.addf %24, %23 : vector<128x1xf32>
    %26 = arith.divf %24, %25 : vector<128x1xf32>
    %27 = arith.mulf %19, %26 : vector<128x1xf32>
    %28 = vector.broadcast %27 : vector<128x1xf32> to vector<128x256xf32>
    %29 = arith.mulf %1, %28 : vector<128x256xf32>
    %c0_16 = arith.constant 0 : index
    %c0_17 = arith.constant 0 : index
    %c0_18 = arith.constant 0 : index
    %30 = vector.load %arg5[%c0_16, %c0_17, %c0_18] : memref<1x128x256xf32, #tpu.memory_space<vmem>>, vector<1x128x256xf32>
    %31 = vector.shape_cast %30 : vector<1x128x256xf32> to vector<128x256xf32>
    %32 = vector.shape_cast %29 : vector<128x256xf32> to vector<1x128x256xf32>
    tpu.vector_store %arg5[%c0_16, %c0_17, %c0_18], %32 {strides = array<i32>} : memref<1x128x256xf32, #tpu.memory_space<vmem>>, vector<1x128x256xf32>,
    return
  }
  func.func @transform_0(%arg0: i32) -> (i32, i32, i32) {
    %c0_i32 = arith.constant 0 : i32
    %c0_i32_0 = arith.constant 0 : i32
    %c0_i32_1 = arith.constant 0 : i32
    return %arg0, %c0_i32, %c0_i32_0 : i32, i32, i32
  }
  func.func @transform_1(%arg0: i32) -> (i32, i32) {
    %c0_i32 = arith.constant 0 : i32
    %c0_i32_0 = arith.constant 0 : i32
    %c0_i32_1 = arith.constant 0 : i32
    return %c0_i32, %c0_i32_0 : i32, i32
  }
  func.func @transform_2(%arg0: i32) -> (i32, i32) {
    %c0_i32 = arith.constant 0 : i32
    %c0_i32_0 = arith.constant 0 : i32
    %c0_i32_1 = arith.constant 0 : i32
    return %c0_i32, %c0_i32_0 : i32, i32
  }
  func.func @transform_3(%arg0: i32) -> (i32, i32) {
    %c0_i32 = arith.constant 0 : i32
    %c0_i32_0 = arith.constant 0 : i32
    %c0_i32_1 = arith.constant 0 : i32
    return %c0_i32, %c0_i32_0 : i32, i32
  }
  func.func @transform_4(%arg0: i32) -> (i32, i32, i32) {
    %c0_i32 = arith.constant 0 : i32
    %c0_i32_0 = arith.constant 0 : i32
    %c0_i32_1 = arith.constant 0 : i32
    return %arg0, %c0_i32, %c0_i32_0 : i32, i32, i32
  }
}

</mosaic_0001>

<bundles_post_ra>
// kernel: se_attention_pallas.1
= control target key start
LH: loop header
LB: loop body
LE: loop exit
PB: predicated region body
PF: predicated region fallthrough
CT: control target
= control target key end

     0   :  { %s1719_s15 = smov 0   ;;  %s2158_s0 = inlined_call_operand.vmem [shape: f32[2,128,256], index: 0, kind: input, shape index: {}]   ;;  %s2159_s1 = inlined_call_operand.vmem [shape: f32[8,128], index: 1, kind: input, shape index: {}]   ;;  %s2160_s2 = inlined_call_operand.vmem [shape: f32[128,8], index: 2, kind: input, shape index: {}]   ;;  %s2161_s3 = inlined_call_operand.vmem [shape: f32[128,128], index: 3, kind: input, shape index: {}]   ;;  %s2162_s4 = inlined_call_operand.vmem [shape: f32[2,128,256], index: 4, kind: output, shape index: {}]  }
   0x1 LB: > { %s1208_s16 = sadd.s32 4294967295, %s1688_s15   ;;  %p1212_p0 = scmp.ge.s32.totalorder %s1688_s15, 1  ;;  %s1688_s15 = sphi %s1719_s15, %s14_s15  }
   0x2   : > { %p162_p1 = scmp.lt.s32.totalorder %s1688_s15, 3 }
   0x4   : > { %p163_p2 = pnand %p1212_p0, %p162_p1 }
   0x5   : > { %p188_p3 = scmp.lt.s32.totalorder (!%p163_p2), %s1208_s16, 1  ;;  %v1690_v44 = vmov (!%p163_p2), 0.0|0.0   ;;  %vm1691_vm0 = vmmov (!%p163_p2), 0   ;;  %v1692_v49 = vmov (!%p163_p2), 0.0   ;;  %vm446_vm1 = vcmask (!%p163_p2), 64512  }
   0x6   : > { %166 = sbr.rel (%p163_p2) target bundleno = 1105 (0x451), region = 36  ;;  %1452 = vmatprep.subr.bf16.mxu0 (!%p163_p2), %v1690_v44  ;;  %1367 = vmatprep.mubr.msk.f32.mxu0 (!%p163_p2), %vm1691_vm0, %v1692_v49 }
   0xd   : > { %s2164_s16 = smov (!%p188_p3, %s1208_s16), 1 }
   0xe   : > { %s1267_s17 = sshll.u32 %s2164_s16, 8 }
   0xf   : > { %s1735_s20 = scalar_lea.vmem %s2158_s0, %s1267_s17  ;;  %s2089_s23 = scalar_lea.vmem %s2162_s4, %s1267_s17 }
  0x10   : > { %v1738_v0 = vld [vmem:[%s1735_s20 + $0x20] sm:$0xff]  ;;  %v1741_v1 = vld [vmem:[%s1735_s20 + $0x28] sm:$0xff]  ;;  %v1752_v5 = vld [vmem:[%s1735_s20 + $0x30] sm:$0xff] }
  0x11   : > { %v1744_v2 = vld [vmem:[%s1735_s20] sm:$0xff]  ;;  %v236_v3 = vadd.f32 %v1741_v1, %v1738_v0  ;;  %v1749_v4 = vld [vmem:[%s1735_s20 + $0x8] sm:$0xff]  ;;  %v1755_v6 = vld [vmem:[%s1735_s20 + $0x38] sm:$0xff] }
  0x12   : > { %v230_v7 = vadd.f32 %v1749_v4, %v1744_v2  ;;  %v1760_v8 = vld [vmem:[%s1735_s20 + $0x10] sm:$0xff]  ;;  %v1763_v9 = vld [vmem:[%s1735_s20 + $0x18] sm:$0xff]  ;;  %v239_v10 = vadd.f32 %v1755_v6, %v1752_v5  ;;  %v1776_v14 = vld [vmem:[%s1735_s20 + $0x40] sm:$0xff] }
  0x13   : > { %237 = vadd.xlane.f32.xlu1 %v236_v3  ;;  %v233_v11 = vadd.f32 %v1763_v9, %v1760_v8  ;;  %v1770_v12 = vld [vmem:[%s1735_s20 + $0x50] sm:$0xff]  ;;  %v1773_v13 = vld [vmem:[%s1735_s20 + $0x58] sm:$0xff]  ;;  %v1779_v15 = vld [vmem:[%s1735_s20 + $0x48] sm:$0xff] }
  0x14   : > { %231 = vadd.xlane.f32.xlu0 %v230_v7  ;;  %v245_v16 = vadd.f32 %v1773_v13, %v1770_v12  ;;  %v242_v17 = vadd.f32 %v1779_v15, %v1776_v14  ;;  %v1786_v18 = vld [vmem:[%s1735_s20 + $0x70] sm:$0xff]  ;;  %v1789_v19 = vld [vmem:[%s1735_s20 + $0x78] sm:$0xff]  ;;  %v1792_v20 = vld [vmem:[%s1735_s20 + $0x60] sm:$0xff] }
  0x15   : > { %v1795_v21 = vld [vmem:[%s1735_s20 + $0x68] sm:$0xff]  ;;  %v251_v22 = vadd.f32 %v1789_v19, %v1786_v18  ;;  %v1802_v24 = vld [vmem:[%s1735_s20 + $0x90] sm:$0xff]  ;;  %v1805_v25 = vld [vmem:[%s1735_s20 + $0x98] sm:$0xff] }
  0x16   : > { %v248_v23 = vadd.f32 %v1795_v21, %v1792_v20  ;;  %v1808_v26 = vld [vmem:[%s1735_s20 + $0x80] sm:$0xff]  ;;  %v1811_v27 = vld [vmem:[%s1735_s20 + $0x88] sm:$0xff]  ;;  %v257_v28 = vadd.f32 %v1805_v25, %v1802_v24  ;;  %v1818_v30 = vld [vmem:[%s1735_s20 + $0xb0] sm:$0xff] }
  0x17   : > { %240 = vadd.xlane.f32.xlu1 %v239_v10  ;;  %v254_v29 = vadd.f32 %v1811_v27, %v1808_v26  ;;  %v1821_v31 = vld [vmem:[%s1735_s20 + $0xb8] sm:$0xff]  ;;  %v1824_v32 = vld [vmem:[%s1735_s20 + $0xa0] sm:$0xff]  ;;  %v1827_v33 = vld [vmem:[%s1735_s20 + $0xa8] sm:$0xff] }
  0x18   : > { %234 = vadd.xlane.f32.xlu0 %v233_v11  ;;  %v263_v34 = vadd.f32 %v1821_v31, %v1818_v30  ;;  %v260_v35 = vadd.f32 %v1827_v33, %v1824_v32  ;;  %v1834_v36 = vld [vmem:[%s1735_s20 + $0xd0] sm:$0xff]  ;;  %v1837_v37 = vld [vmem:[%s1735_s20 + $0xd8] sm:$0xff]  ;;  %v1840_v38 = vld [vmem:[%s1735_s20 + $0xc0] sm:$0xff] }
  0x19   : > { %v1843_v39 = vld [vmem:[%s1735_s20 + $0xc8] sm:$0xff]  ;;  %v269_v40 = vadd.f32 %v1837_v37, %v1834_v36  ;;  %v1850_v42 = vld [vmem:[%s1735_s20 + $0xf0] sm:$0xff]  ;;  %v1853_v43 = vld [vmem:[%s1735_s20 + $0xf8] sm:$0xff] }
  0x1a   : > { %v266_v41 = vadd.f32 %v1843_v39, %v1840_v38  ;;  %v1857_v45 = vld [vmem:[%s1735_s20 + $0xe0] sm:$0xff]  ;;  %v1860_v46 = vld [vmem:[%s1735_s20 + $0xe8] sm:$0xff]  ;;  %v275_v47 = vadd.f32 %v1853_v43, %v1850_v42 }
  0x1b   : > { %246 = vadd.xlane.f32.xlu1 %v245_v16  ;;  %v272_v48 = vadd.f32 %v1860_v46, %v1857_v45 }
  0x1c   : > { %243 = vadd.xlane.f32.xlu0 %v242_v17 }
  0x1f   : > { %252 = vadd.xlane.f32.xlu1 %v251_v22 }
  0x20   : > { %249 = vadd.xlane.f32.xlu0 %v248_v23 }
  0x23   : > { %258 = vadd.xlane.f32.xlu1 %v257_v28 }
  0x24   : > { %255 = vadd.xlane.f32.xlu0 %v254_v29 }
  0x27   : > { %264 = vadd.xlane.f32.xlu1 %v263_v34 }
  0x28   : > { %261 = vadd.xlane.f32.xlu0 %v260_v35 }
  0x2b   : > { %270 = vadd.xlane.f32.xlu1 %v269_v40 }
  0x2c   : > { %267 = vadd.xlane.f32.xlu0 %v266_v41 }
  0x2f   : > { %276 = vadd.xlane.f32.xlu1 %v275_v47 }
  0x30   : > { %273 = vadd.xlane.f32.xlu0 %v272_v48 }
  0xa0   : > { %v238_v50 = vpop.xlane.xlu1 %237 }
  0xa1   : > { %v232_v51 = vpop.xlane.xlu0 %231  ;;  %v328_v56 = vmul.f32 0.00390625, %v238_v50 }
  0xa2   : > { %v326_v54 = vmul.f32 0.00390625, %v232_v51 }
  0xa4   : > { %v241_v52 = vpop.xlane.xlu1 %240 }
  0xa5   : > { %v235_v53 = vpop.xlane.xlu0 %234  ;;  %v329_v57 = vmul.f32 0.00390625, %v241_v52 }
  0xa6   : > { %v327_v55 = vmul.f32 0.00390625, %v235_v53 }
  0xa7   : > { %v1456_v63 = vpack.c.bf16 %v329_v57, %v328_v56 }
  0xa8   : > { %v1453_v58 = vpack.c.bf16 %v327_v55, %v326_v54  ;;  %v247_v59 = vpop.xlane.xlu1 %246 }
  0xa9   : > { %v244_v60 = vpop.xlane.xlu0 %243  ;;  %v331_v61 = vmul.f32 0.00390625, %v247_v59  ;;  %v342_v59 = vld [vmem:[%s2159_s1] sm:$0xff] }
  0xaa   : > { %1454 = vmatpush3.bf16.msra.mxu0 %v1453_v58  ;;  %v330_v62 = vmul.f32 0.00390625, %v244_v60  ;;  %v343_v60 = vld [vmem:[%s2160_s2] sm:$0xff] }
  0xab   : > { %1455 = vmatprep.subr.bf16.mxu0 %v1690_v44  ;;  %1372 = vmatprep.mubr.msk.f32.mxu1 %vm446_vm1, %v343_v60 }
  0xac   : > { %v253_v3 = vpop.xlane.xlu1 %252  ;;  %v1459_v10 = vpack.c.bf16 %v331_v61, %v330_v62  ;;  %v281_v61 = vmax.f32 %v1760_v8, %v1763_v9  ;;  %v278_v62 = vmax.f32 %v1744_v2, %v1749_v4  ;;  %v299_v2 = vmax.f32 %v1786_v18, %v1789_v19  ;;  %v344_v19 = vld [vmem:[%s2160_s2 + $0x8] sm:$0xff] }
  0xad   : > { %v250_v7 = vpop.xlane.xlu0 %249  ;;  %v333_v11 = vmul.f32 0.00390625, %v253_v3  ;;  %v293_v3 = vmax.f32 %v1770_v12, %v1773_v13  ;;  %v296_v4 = vmax.f32 %v1792_v20, %v1795_v21  ;;  %v317_v8 = vmax.f32 %v1834_v36, %v1837_v37  ;;  %v345_v20 = vld [vmem:[%s2160_s2 + $0x10] sm:$0xff]  ;;  %v346_v21 = vld [vmem:[%s2160_s2 + $0x18] sm:$0xff]  ;;  %v355_v36 = vld [vmem:[%s2160_s2 + $0x60] sm:$0xff] }
  0xae   : > { %1457 = vmatpush3.bf16.msra.mxu0 %v1456_v63  ;;  %v332_v16 = vmul.f32 0.00390625, %v250_v7  ;;  %282 = vmax.xlane.f32.xlu1 %v281_v61  ;;  %v284_v63 = vmax.f32 %v1738_v0, %v1741_v1  ;;  %v290_v7 = vmax.f32 %v1776_v14, %v1779_v15  ;;  %v305_v0 = vmax.f32 %v1802_v24, %v1805_v25  ;;  %v347_v24 = vld [vmem:[%s2160_s2 + $0x20] sm:$0xff]  ;;  %v348_v25 = vld [vmem:[%s2160_s2 + $0x28] sm:$0xff] }
  0xaf   : > { %1458 = vmatprep.subr.bf16.mxu0 %v1690_v44  ;;  %279 = vmax.xlane.f32.xlu0 %v278_v62  ;;  %v302_v1 = vmax.f32 %v1808_v26, %v1811_v27  ;;  %v314_v9 = vmax.f32 %v1840_v38, %v1843_v39  ;;  %v323_v12 = vmax.f32 %v1850_v42, %v1853_v43  ;;  %v349_v26 = vld [vmem:[%s2160_s2 + $0x30] sm:$0xff]  ;;  %v350_v27 = vld [vmem:[%s2160_s2 + $0x38] sm:$0xff]  ;;  %v356_v37 = vld [vmem:[%s2160_s2 + $0x68] sm:$0xff] }
  0xb0   : > { %v259_v17 = vpop.xlane.xlu1 %258  ;;  %v1462_v23 = vpack.c.bf16 %v333_v11, %v332_v16  ;;  %v320_v13 = vmax.f32 %v1857_v45, %v1860_v46  ;;  %v357_v38 = vld [vmem:[%s2160_s2 + $0x70] sm:$0xff]  ;;  %v358_v39 = vld [vmem:[%s2160_s2 + $0x78] sm:$0xff]  ;;  %v359_v42 = vld [vmem:[%s2161_s3] sm:$0xff] }
  0xb1   : > { %v256_v22 = vpop.xlane.xlu0 %255  ;;  %v335_v28 = vmul.f32 0.00390625, %v259_v17 }
  0xb2   : > { %1460 = vmatpush3.bf16.msra.mxu0 %v1459_v10  ;;  %v334_v29 = vmul.f32 0.00390625, %v256_v22 }
  0xb3   : > { %1461 = vmatprep.subr.bf16.mxu0 %v1690_v44  ;;  %285 = vmax.xlane.f32.xlu0 %v284_v63 }
  0xb4   : > { %v265_v34 = vpop.xlane.xlu1 %264  ;;  %v1465_v40 = vpack.c.bf16 %v335_v28, %v334_v29 }
  0xb5   : > { %v262_v35 = vpop.xlane.xlu0 %261  ;;  %v337_v41 = vmul.f32 0.00390625, %v265_v34 }
  0xb6   : > { %1463 = vmatpush3.bf16.msra.mxu0 %v1462_v23  ;;  %v336_v47 = vmul.f32 0.00390625, %v262_v35 }
  0xb7   : > { %1464 = vmatprep.subr.bf16.mxu0 %v1690_v44  ;;  %291 = vmax.xlane.f32.xlu0 %v290_v7 }
  0xb8   : > { %v271_v48 = vpop.xlane.xlu1 %270  ;;  %v1468_v50 = vpack.c.bf16 %v337_v41, %v336_v47 }
  0xb9   : > { %v268_v49 = vpop.xlane.xlu0 %267  ;;  %v339_v51 = vmul.f32 0.00390625, %v271_v48 }
  0xba   : > { %1466 = vmatpush3.bf16.msra.mxu0 %v1465_v40  ;;  %v338_v52 = vmul.f32 0.00390625, %v268_v49 }
  0xbb   : > { %1467 = vmatprep.subr.bf16.mxu0 %v1690_v44  ;;  %297 = vmax.xlane.f32.xlu0 %v296_v4 }
  0xbc   : > { %v277_v53 = vpop.xlane.xlu1 %276  ;;  %v1471_v55 = vpack.c.bf16 %v339_v51, %v338_v52 }
  0xbd   : > { %v274_v54 = vpop.xlane.xlu0 %273  ;;  %v341_v56 = vmul.f32 0.00390625, %v277_v53 }
  0xbe   : > { %1469 = vmatpush3.bf16.msra.mxu0 %v1468_v50  ;;  %v340_v57 = vmul.f32 0.00390625, %v274_v54 }
  0xbf   : > { %1470 = vmatprep.subr.bf16.mxu0 %v1690_v44  ;;  %303 = vmax.xlane.f32.xlu0 %v302_v1 }
  0xc0   : > { %v1474_v58 = vpack.c.bf16 %v341_v56, %v340_v57 }
  0xc2   : > { %1472 = vmatpush3.bf16.msra.mxu0 %v1471_v55 }
  0xc3   : > { %1473 = vmatprep.subr.bf16.mxu0 %v1690_v44  ;;  %v287_v44 = vmax.f32 %v1752_v5, %v1755_v6  ;;  %v311_v5 = vmax.f32 %v1818_v30, %v1821_v31  ;;  %v308_v6 = vmax.f32 %v1824_v32, %v1827_v33  ;;  %v351_v30 = vld [vmem:[%s2160_s2 + $0x40] sm:$0xff]  ;;  %v352_v31 = vld [vmem:[%s2160_s2 + $0x48] sm:$0xff]  ;;  %v353_v32 = vld [vmem:[%s2160_s2 + $0x50] sm:$0xff] }
  0xc4   : > { %v354_v33 = vld [vmem:[%s2160_s2 + $0x58] sm:$0xff] }
  0xc5   : > { %288 = vmax.xlane.f32.xlu1 %v287_v44  ;;  %309 = vmax.xlane.f32.xlu0 %v308_v6 }
  0xc6   : > { %1475 = vmatpush3.bf16.msra.mxu0 %v1474_v58 }
  0xc9   : > { %1368 = vmatmul.mubr.f32.vlgmr.msra.gmra.mrb[0].mxu0 %v342_v59  ;;  %294 = vmax.xlane.f32.xlu1 %v293_v3 }
  0xca   : > { %315 = vmax.xlane.f32.xlu0 %v314_v9 }
  0xcd   : > { %300 = vmax.xlane.f32.xlu1 %v299_v2 }
  0xce   : > { %321 = vmax.xlane.f32.xlu0 %v320_v13 }
  0xd1   : > { %306 = vmax.xlane.f32.xlu1 %v305_v0 }
  0xd5   : > { %312 = vmax.xlane.f32.xlu1 %v311_v5 }
  0xd9   : > { %318 = vmax.xlane.f32.xlu1 %v317_v8 }
  0xdd   : > { %324 = vmax.xlane.f32.xlu1 %v323_v12 }
 0x13b   : > { %v283_v40 = vpop.xlane.xlu1 %282 }
 0x13c   : > { %v280_v49 = vpop.xlane.xlu0 %279 }
 0x140   : > { %v286_v44 = vpop.xlane.xlu0 %285 }
 0x152   : > { %v289_v61 = vpop.xlane.xlu1 %288 }
 0x156   : > { %v295_v8 = vpop.xlane.xlu1 %294 }
 0x19c   : > { %v441_v14 = vpop.f32.mrb[0].mxu0 }
 0x19d   : > { %v445_v15 = vmax.f32 %v441_v14, 0.0  ;;  %v1369_v18 = vpop.f32.mrb[1].mxu0  ;;  %v292_v14 = vpop.xlane.xlu0 %291 }
 0x19f   : > { %1370 = vmatprep.subr.mxu1 %v445_v15 }
 0x1a0   : > { %1371 = vmatpush3.msra.mxu1 %v445_v15 }
 0x1a1   : > { %1373 = vmatmul.mubr.msk.f32.vlgmr.msra.gmra.mrb[0].mxu1 %vm446_vm1, %v344_v19 }
 0x1a2   : > { %1375 = vmatprep.mubr.msk.f32.mxu1 %vm446_vm1, %v345_v20 }
 0x1a5   : > { %1376 = vmatmul.mubr.msk.f32.gmra.mrb[2].mxu1 %vm446_vm1, %v346_v21 }
 0x1a6   : > { %1378 = vmatprep.mubr.msk.f32.mxu1 %vm446_vm1, %v347_v24 }
 0x1a9   : > { %1379 = vmatmul.mubr.msk.f32.gmra.mrb[4].mxu1 %vm446_vm1, %v348_v25 }
 0x1aa   : > { %1381 = vmatprep.mubr.msk.f32.mxu1 %vm446_vm1, %v349_v26 }
 0x1ad   : > { %1382 = vmatmul.mubr.msk.f32.gmra.mrb[6].mxu1 %vm446_vm1, %v350_v27 }
 0x1ae   : > { %1384 = vmatprep.mubr.msk.f32.mxu1 %vm446_vm1, %v351_v30 }
 0x1b1   : > { %1385 = vmatmul.mubr.msk.f32.gmra.mrb[8].mxu1 %vm446_vm1, %v352_v31 }
 0x1b2   : > { %1387 = vmatprep.mubr.msk.f32.mxu1 %vm446_vm1, %v353_v32 }
 0x1b5   : > { %1388 = vmatmul.mubr.msk.f32.gmra.mrb[10].mxu1 %vm446_vm1, %v354_v33 }
 0x1b6   : > { %1390 = vmatprep.mubr.msk.f32.mxu1 %vm446_vm1, %v355_v36 }
 0x1b9   : > { %1391 = vmatmul.mubr.msk.f32.gmra.mrb[12].mxu1 %vm446_vm1, %v356_v37 }
 0x1ba   : > { %1393 = vmatprep.mubr.msk.f32.mxu1 %vm446_vm1, %v357_v38 }
 0x1bd   : > { %1394 = vmatmul.mubr.msk.f32.gmra.mrb[14].mxu1 %vm446_vm1, %v358_v39  ;;  %v301_v39 = vpop.xlane.xlu1 %300 }
 0x1be   : > { %1428 = vmatprep.mubr.f32.mxu1 %v359_v42 }
 0x274   : > { %v1374_v43 = vpop.f32.mrb[0].mxu1 }
 0x275   : > { %v1234_v45 = vmul.f32 -1.442695, %v1374_v43  ;;  %v561_v46 = vpop.f32.mrb[1].mxu1 }
 0x276   : > { %v1233_v10 = vmul.f32 -1.442695, %v561_v46 }
 0x277   : > { %1522 = vpow2.f32 %v1234_v45  ;;  %v298_v45 = vpop.xlane.xlu0 %297 }
 0x278   : > { %1524 = vpow2.f32 %v1233_v10  ;;  %v1377_v11 = vpop.f32.mrb[2].mxu1 }
 0x279   : > { %v1236_v16 = vmul.f32 -1.442695, %v1377_v11  ;;  %v571_v17 = vpop.f32.mrb[3].mxu1 }
 0x27a   : > { %v1235_v22 = vmul.f32 -1.442695, %v571_v17 }
 0x27b   : > { %1526 = vpow2.f32 %v1236_v16 }
 0x27c   : > { %1528 = vpow2.f32 %v1235_v22  ;;  %v1380_v23 = vpop.f32.mrb[4].mxu1 }
 0x27d   : > { %v1238_v28 = vmul.f32 -1.442695, %v1380_v23  ;;  %v581_v29 = vpop.f32.mrb[5].mxu1 }
 0x27e   : > { %v1237_v34 = vmul.f32 -1.442695, %v581_v29 }
 0x27f   : > { %1530 = vpow2.f32 %v1238_v28 }
 0x280   : > { %1532 = vpow2.f32 %v1237_v34  ;;  %v1383_v35 = vpop.f32.mrb[6].mxu1 }
 0x281   : > { %v1523_v41 = vpop.eup %1522  ;;  %v1240_v47 = vmul.f32 -1.442695, %v1383_v35  ;;  %v591_v48 = vpop.f32.mrb[7].mxu1 }
 0x282   : > { %v1525_v50 = vpop.eup %1524  ;;  %v689_v51 = vadd.f32 1.0, %v1523_v41  ;;  %v1239_v52 = vmul.f32 -1.442695, %v591_v48  ;;  %v304_v48 = vpop.xlane.xlu0 %303 }
 0x283   : > { %v688_v53 = vadd.f32 1.0, %v1525_v50  ;;  %1534 = vpow2.f32 %v1240_v47 }
 0x284   : > { %1536 = vrcp.f32 %v689_v51  ;;  %v1386_v54 = vpop.f32.mrb[8].mxu1 }
 0x285   : > { %v1527_v55 = vpop.eup %1526  ;;  %1538 = vrcp.f32 %v688_v53  ;;  %v1242_v56 = vmul.f32 -1.442695, %v1386_v54  ;;  %v601_v57 = vpop.f32.mrb[9].mxu1 }
 0x286   : > { %v1529_v58 = vpop.eup %1528  ;;  %v691_v59 = vadd.f32 1.0, %v1527_v55  ;;  %1540 = vpow2.f32 %v1239_v52  ;;  %v1241_v60 = vmul.f32 -1.442695, %v601_v57 }
 0x287   : > { %v690_v62 = vadd.f32 1.0, %v1529_v58  ;;  %1542 = vpow2.f32 %v1242_v56 }
 0x288   : > { %1544 = vrcp.f32 %v691_v59  ;;  %v1389_v63 = vpop.f32.mrb[10].mxu1 }
 0x289   : > { %v1531_v3 = vpop.eup %1530  ;;  %1546 = vrcp.f32 %v690_v62  ;;  %v1244_v7 = vmul.f32 -1.442695, %v1389_v63  ;;  %v611_v2 = vpop.f32.mrb[11].mxu1 }
 0x28a   : > { %v1533_v4 = vpop.eup %1532  ;;  %v693_v0 = vadd.f32 1.0, %v1531_v3  ;;  %1548 = vpow2.f32 %v1241_v60  ;;  %v1243_v1 = vmul.f32 -1.442695, %v611_v2  ;;  %v310_v60 = vpop.xlane.xlu0 %309 }
 0x28b   : > { %v692_v5 = vadd.f32 1.0, %v1533_v4  ;;  %1550 = vpow2.f32 %v1244_v7 }
 0x28c   : > { %1552 = vrcp.f32 %v693_v0  ;;  %v1392_v6 = vpop.f32.mrb[12].mxu1 }
 0x28d   : > { %v1535_v9 = vpop.eup %1534  ;;  %1554 = vrcp.f32 %v692_v5  ;;  %v1246_v12 = vmul.f32 -1.442695, %v1392_v6  ;;  %v621_v13 = vpop.f32.mrb[13].mxu1 }
 0x28e   : > { %v1975_v15 = vpop.eup %1536  ;;  %v695_v18 = vadd.f32 1.0, %v1535_v9  ;;  %1556 = vpow2.f32 %v1243_v1  ;;  %v1245_v19 = vmul.f32 -1.442695, %v621_v13 }
 0x28f   : > { %v1977_v20 = vpop.eup %1538  ;;  %1558 = vpow2.f32 %v1246_v12  ;;  %v737_v21 = vmul.f32 %v1975_v15, %v283_v40  ;;  %v307_v40 = vpop.xlane.xlu1 %306 }
 0x290   : > { %v1541_v24 = vpop.eup %1540  ;;  %1560 = vrcp.f32 %v695_v18  ;;  %v736_v25 = vmul.f32 %v1977_v20, %v280_v49  ;;  %v1395_v26 = vpop.f32.mrb[14].mxu1 }
 0x291   : > { %v1543_v27 = vpop.eup %1542  ;;  %v694_v30 = vadd.f32 1.0, %v1541_v24  ;;  %1562 = vpow2.f32 %v1245_v19  ;;  %v1248_v31 = vmul.f32 -1.442695, %v1395_v26  ;;  %v631_v32 = vpop.f32.mrb[15].mxu1 }
 0x292   : > { %v1981_v33 = vpop.eup %1544  ;;  %v697_v36 = vadd.f32 1.0, %v1543_v27  ;;  %v1476_v37 = vpack.c.bf16 %v737_v21, %v736_v25  ;;  %v1247_v38 = vmul.f32 -1.442695, %v631_v32 }
 0x293   : > { %v1983_v42 = vpop.eup %1546  ;;  %1564 = vrcp.f32 %v694_v30  ;;  %v739_v43 = vmul.f32 %v1981_v33, %v289_v61  ;;  %v313_v58 = vpop.xlane.xlu1 %312 }
 0x294   : > { %v1549_v46 = vpop.eup %1548  ;;  %1566 = vrcp.f32 %v697_v36  ;;  %v738_v10 = vmul.f32 %v1983_v42, %v286_v44  ;;  %1477 = vmatprep.subr.bf16.mxu1 %v1476_v37  ;;  %v360_v36 = vld [vmem:[%s2161_s3 + $0x8] sm:$0xff] }
 0x295   : > { %v1551_v11 = vpop.eup %1550  ;;  %v696_v16 = vadd.f32 1.0, %v1549_v46  ;;  %1568 = vpow2.f32 %v1248_v31  ;;  %1479 = vmatpush3.bf16.msra.mxu1 %v1476_v37  ;;  %v361_v37 = vld [vmem:[%s2161_s3 + $0x10] sm:$0xff]  ;;  %v366_v46 = vld [vmem:[%s2161_s3 + $0x38] sm:$0xff] }
 0x296   : > { %v1987_v17 = vpop.eup %1552  ;;  %v699_v22 = vadd.f32 1.0, %v1551_v11  ;;  %1570 = vpow2.f32 %v1247_v38  ;;  %v1480_v23 = vpack.c.bf16 %v739_v43, %v738_v10  ;;  %v362_v38 = vld [vmem:[%s2161_s3 + $0x18] sm:$0xff]  ;;  %v364_v43 = vld [vmem:[%s2161_s3 + $0x28] sm:$0xff]  ;;  %v367_v10 = vld [vmem:[%s2161_s3 + $0x40] sm:$0xff] }
 0x297   : > { %v1989_v28 = vpop.eup %1554  ;;  %1572 = vrcp.f32 %v696_v16  ;;  %v741_v29 = vmul.f32 %v1987_v17, %v295_v8  ;;  %v319_v5 = vpop.xlane.xlu1 %318  ;;  %v368_v11 = vld [vmem:[%s2161_s3 + $0x48] sm:$0xff]  ;;  %v369_v16 = vld [vmem:[%s2161_s3 + $0x50] sm:$0xff] }
 0x298   : > { %v1557_v34 = vpop.eup %1556  ;;  %1574 = vrcp.f32 %v699_v22  ;;  %v740_v35 = vmul.f32 %v1989_v28, %v292_v14  ;;  %1481 = vmatprep.subr.bf16.mxu1 %v1480_v23  ;;  %v316_v8 = vpop.xlane.xlu0 %315  ;;  %v370_v22 = vld [vmem:[%s2161_s3 + $0x58] sm:$0xff] }
 0x299   : > { %v1559_v41 = vpop.eup %1558  ;;  %v698_v47 = vadd.f32 1.0, %v1557_v34  ;;  %1483 = vmatpush3.bf16.msra.mxu1 %v1480_v23  ;;  %v371_v23 = vld [vmem:[%s2161_s3 + $0x60] sm:$0xff]  ;;  %v373_v34 = vld [vmem:[%s2161_s3 + $0x70] sm:$0xff] }
 0x29a   : > { %v1993_v49 = vpop.eup %1560  ;;  %v701_v50 = vadd.f32 1.0, %v1559_v41  ;;  %v1484_v51 = vpack.c.bf16 %v741_v29, %v740_v35  ;;  %v372_v29 = vld [vmem:[%s2161_s3 + $0x68] sm:$0xff]  ;;  %v374_v35 = vld [vmem:[%s2161_s3 + $0x78] sm:$0xff] }
 0x29b   : > { %v1563_v52 = vpop.eup %1562  ;;  %1576 = vrcp.f32 %v698_v47  ;;  %v743_v54 = vmul.f32 %v1993_v49, %v301_v39  ;;  %v325_v21 = vpop.xlane.xlu1 %324  ;;  %v363_v39 = vld [vmem:[%s2161_s3 + $0x20] sm:$0xff] }
 0x29c   : > { %1578 = vrcp.f32 %v701_v50  ;;  %v700_v53 = vadd.f32 1.0, %v1563_v52  ;;  %1485 = vmatprep.subr.bf16.mxu1 %v1484_v51  ;;  %v322_v25 = vpop.xlane.xlu0 %321 }
 0x29d   : > { %v1996_v55 = vpop.eup %1564  ;;  %1487 = vmatpush3.bf16.msra.mxu1 %v1484_v51 }
 0x29e   : > { %v1998_v56 = vpop.eup %1566  ;;  %1580 = vrcp.f32 %v700_v53  ;;  %v742_v57 = vmul.f32 %v1996_v55, %v298_v45  ;;  %v365_v45 = vld [vmem:[%s2161_s3 + $0x30] sm:$0xff] }
 0x29f   : > { %v1569_v59 = vpop.eup %1568  ;;  %v745_v63 = vmul.f32 %v1998_v56, %v307_v40  ;;  %v1693_v40 = vmov 0  }
 0x2a0   : > { %v1571_v61 = vpop.eup %1570  ;;  %v703_v62 = vadd.f32 1.0, %v1569_v59  ;;  %v1488_v44 = vpack.c.bf16 %v743_v54, %v742_v57  ;;  %1520 = vset.pattern.permute.xlu1 %v1693_v40  ;;  %1521 = vset.pattern.permute.xlu0 %v1693_v40 }
 0x2a1   : > { %v2002_v3 = vpop.eup %1572  ;;  %v702_v7 = vadd.f32 1.0, %v1571_v61 }
 0x2a2   : > { %v2004_v2 = vpop.eup %1574  ;;  %1582 = vrcp.f32 %v703_v62  ;;  %v744_v4 = vmul.f32 %v2002_v3, %v304_v48  ;;  %1489 = vmatprep.subr.bf16.mxu1 %v1488_v44 }
 0x2a3   : > { %1584 = vrcp.f32 %v702_v7  ;;  %1491 = vmatpush3.bf16.msra.mxu1 %v1488_v44  ;;  %v747_v1 = vmul.f32 %v2004_v2, %v313_v58 }
 0x2a4   : > { %v1492_v0 = vpack.c.bf16 %v745_v63, %v744_v4 }
 0x2a5   : > { %v2008_v6 = vpop.eup %1576 }
 0x2a6   : > { %v2010_v9 = vpop.eup %1578  ;;  %v746_v12 = vmul.f32 %v2008_v6, %v310_v60  ;;  %1493 = vmatprep.subr.bf16.mxu1 %v1492_v0 }
 0x2a7   : > { %1495 = vmatpush3.bf16.msra.mxu1 %v1492_v0  ;;  %v749_v13 = vmul.f32 %v2010_v9, %v319_v5 }
 0x2a8   : > { %v2014_v14 = vpop.eup %1580  ;;  %v1496_v18 = vpack.c.bf16 %v747_v1, %v746_v12 }
 0x2a9   : > { %v748_v19 = vmul.f32 %v2014_v14, %v316_v8 }
 0x2aa   : > { %1497 = vmatprep.subr.bf16.mxu1 %v1496_v18 }
 0x2ab   : > { %v1500_v24 = vpack.c.bf16 %v749_v13, %v748_v19  ;;  %1499 = vmatpush3.bf16.msra.mxu1 %v1496_v18 }
 0x2ac   : > { %v2017_v26 = vpop.eup %1582 }
 0x2ad   : > { %v2019_v27 = vpop.eup %1584  ;;  %v751_v30 = vmul.f32 %v2017_v26, %v325_v21  ;;  %1501 = vmatprep.subr.bf16.mxu1 %v1500_v24 }
 0x2ae   : > { %v750_v31 = vmul.f32 %v2019_v27, %v322_v25 }
 0x2af   : > { %1503 = vmatpush3.bf16.msra.mxu1 %v1500_v24 }
 0x2b0   : > { %v1504_v32 = vpack.c.bf16 %v751_v30, %v750_v31 }
 0x2b2   : > { %1505 = vmatprep.subr.bf16.mxu1 %v1504_v32 }
 0x2b3   : > { %1507 = vmatpush3.bf16.msra.mxu1 %v1504_v32 }
 0x2b6   : > { %1429 = vmatmul.mubr.f32.vlgmr.msra.gmra.mrb[16].mxu1 %v360_v36 }
 0x2b7   : > { %1431 = vmatprep.mubr.f32.mxu1 %v361_v37 }
 0x2ba   : > { %1432 = vmatmul.mubr.f32.gmra.mrb[18].mxu1 %v362_v38 }
 0x2bb   : > { %1434 = vmatprep.mubr.f32.mxu1 %v363_v39 }
 0x2be   : > { %1435 = vmatmul.mubr.f32.gmra.mrb[20].mxu1 %v364_v43 }
 0x2bf   : > { %1437 = vmatprep.mubr.f32.mxu1 %v365_v45 }
 0x2c2   : > { %1438 = vmatmul.mubr.f32.gmra.mrb[22].mxu1 %v366_v46 }
 0x2c3   : > { %1440 = vmatprep.mubr.f32.mxu1 %v367_v10 }
 0x2c6   : > { %1441 = vmatmul.mubr.f32.gmra.mrb[24].mxu1 %v368_v11 }
 0x2c7   : > { %1443 = vmatprep.mubr.f32.mxu1 %v369_v16 }
 0x2ca   : > { %1444 = vmatmul.mubr.f32.gmra.mrb[26].mxu1 %v370_v22 }
 0x2cb   : > { %1446 = vmatprep.mubr.f32.mxu1 %v371_v23 }
 0x2ce   : > { %1447 = vmatmul.mubr.f32.gmra.mrb[28].mxu1 %v372_v29 }
 0x2cf   : > { %1449 = vmatprep.mubr.f32.mxu1 %v373_v34 }
 0x2d2   : > { %1450 = vmatmul.mubr.f32.gmra.mrb[30].mxu1 %v374_v35 }
 0x389   : > { %v1430_v41 = vpop.f32.mrb[16].mxu1 }
 0x38a   : > { %v1250_v47 = vmul.f32 -1.442695, %v1430_v41  ;;  %v818_v48 = vpop.f32.mrb[17].mxu1 }
 0x38b   : > { %v1249_v50 = vmul.f32 -1.442695, %v818_v48 }
 0x38c   : > { %1586 = vpow2.f32 %v1250_v47 }
 0x38d   : > { %1588 = vpow2.f32 %v1249_v50  ;;  %v1433_v51 = vpop.f32.mrb[18].mxu1 }
 0x38e   : > { %v1252_v52 = vmul.f32 -1.442695, %v1433_v51  ;;  %v828_v53 = vpop.f32.mrb[19].mxu1 }
 0x38f   : > { %v1251_v54 = vmul.f32 -1.442695, %v828_v53 }
 0x390   : > { %1590 = vpow2.f32 %v1252_v52 }
 0x391   : > { %1592 = vpow2.f32 %v1251_v54  ;;  %v1436_v57 = vpop.f32.mrb[20].mxu1 }
 0x392   : > { %v1254_v58 = vmul.f32 -1.442695, %v1436_v57  ;;  %v838_v59 = vpop.f32.mrb[21].mxu1 }
 0x393   : > { %v1253_v60 = vmul.f32 -1.442695, %v838_v59 }
 0x394   : > { %1594 = vpow2.f32 %v1254_v58 }
 0x395   : > { %v1439_v61 = vpop.f32.mrb[22].mxu1  ;;  %1596 = vpow2.f32 %v1253_v60 }
 0x396   : > { %v1587_v62 = vpop.eup %1586  ;;  %v1256_v44 = vmul.f32 -1.442695, %v1439_v61  ;;  %v848_v63 = vpop.f32.mrb[23].mxu1 }
 0x397   : > { %v1589_v7 = vpop.eup %1588  ;;  %v946_v4 = vadd.f32 1.0, %v1587_v62  ;;  %v1255_v8 = vmul.f32 -1.442695, %v848_v63 }
 0x398   : > { %v945_v0 = vadd.f32 1.0, %v1589_v7  ;;  %1598 = vpow2.f32 %v1256_v44 }
 0x399   : > { %1600 = vrcp.f32 %v946_v4  ;;  %v1442_v1 = vpop.f32.mrb[24].mxu1 }
 0x39a   : > { %v1591_v5 = vpop.eup %1590  ;;  %1602 = vrcp.f32 %v945_v0  ;;  %v1258_v12 = vmul.f32 -1.442695, %v1442_v1  ;;  %v858_v13 = vpop.f32.mrb[25].mxu1 }
 0x39b   : > { %v1593_v18 = vpop.eup %1592  ;;  %v948_v19 = vadd.f32 1.0, %v1591_v5  ;;  %v1257_v30 = vmul.f32 -1.442695, %v858_v13 }
 0x39c   : > { %v947_v21 = vadd.f32 1.0, %v1593_v18  ;;  %1604 = vpow2.f32 %v1258_v12 }
 0x39d   : > { %1606 = vrcp.f32 %v948_v19  ;;  %v1445_v24 = vpop.f32.mrb[26].mxu1 }
 0x39e   : > { %v1595_v25 = vpop.eup %1594  ;;  %1608 = vpow2.f32 %v1255_v8  ;;  %v1260_v31 = vmul.f32 -1.442695, %v1445_v24  ;;  %v868_v32 = vpop.f32.mrb[27].mxu1 }
 0x39f   : > { %1610 = vrcp.f32 %v947_v21  ;;  %v950_v36 = vadd.f32 1.0, %v1595_v25  ;;  %v1597_v37 = vpop.eup %1596  ;;  %v1259_v38 = vmul.f32 -1.442695, %v868_v32 }
 0x3a0   : > { %1612 = vpow2.f32 %v1260_v31  ;;  %v949_v11 = vadd.f32 1.0, %v1597_v37 }
 0x3a1   : > { %v1448_v39 = vpop.f32.mrb[28].mxu1  ;;  %1614 = vpow2.f32 %v1257_v30 }
 0x3a2   : > { %v1599_v43 = vpop.eup %1598  ;;  %v1262_v45 = vmul.f32 -1.442695, %v1448_v39  ;;  %v878_v46 = vpop.f32.mrb[29].mxu1  ;;  %1616 = vrcp.f32 %v950_v36 }
 0x3a3   : > { %v1601_v10 = vpop.eup %1600  ;;  %v1261_v22 = vmul.f32 -1.442695, %v878_v46  ;;  %v952_v48 = vadd.f32 1.0, %v1599_v43  ;;  %v1652_v46 = vld [vmem:[%s1735_s20] sm:$0xff] }
 0x3a4   : > { %v1603_v16 = vpop.eup %1602  ;;  %1618 = vpow2.f32 %v1262_v45  ;;  %v994_v23 = vmul.f32 %v1601_v10, %v1975_v15 }
 0x3a5   : > { %1620 = vpow2.f32 %v1259_v38  ;;  %v1451_v29 = vpop.f32.mrb[30].mxu1  ;;  %v993_v34 = vmul.f32 %v1603_v16, %v1977_v20 }
 0x3a6   : > { %v1605_v35 = vpop.eup %1604  ;;  %v1264_v40 = vmul.f32 -1.442695, %v1451_v29  ;;  %1016 = vperm.xlu1 %1520, %v994_v23   ;;  %v888_v41 = vpop.f32.mrb[31].mxu1  ;;  %1622 = vrcp.f32 %v949_v11  ;;  %v1653_v11 = vld [vmem:[%s1735_s20 + $0x8] sm:$0xff]  ;;  %v1654_v23 = vld [vmem:[%s1735_s20 + $0x30] sm:$0xff] }
 0x3a7   : > { %v1607_v47 = vpop.eup %1606  ;;  %v954_v50 = vadd.f32 1.0, %v1605_v35  ;;  %1011 = vperm.xlu0 %1521, %v993_v34   ;;  %1624 = vpow2.f32 %v1261_v22  ;;  %v1263_v54 = vmul.f32 -1.442695, %v888_v41  ;;  %v1655_v34 = vld [vmem:[%s1735_s20 + $0x38] sm:$0xff]  ;;  %v1656_v41 = vld [vmem:[%s1735_s20 + $0x20] sm:$0xff] }
 0x3a8   : > { %v1609_v51 = vpop.eup %1608  ;;  %v996_v52 = vmul.f32 %v1607_v47, %v1981_v33 }
 0x3a9   : > { %v1611_v53 = vpop.eup %1610  ;;  %1626 = vrcp.f32 %v954_v50  ;;  %v951_v20 = vadd.f32 1.0, %v1609_v51 }
 0x3aa   : > { %v1613_v15 = vpop.eup %1612  ;;  %1628 = vpow2.f32 %v1264_v40  ;;  %1026 = vperm.xlu1 %1520, %v996_v52   ;;  %v995_v59 = vmul.f32 %v1611_v53, %v1983_v42  ;;  %v1658_v52 = vld [vmem:[%s1735_s20 + $0x50] sm:$0xff] }
 0x3ab   : > { %1630 = vrcp.f32 %v952_v48  ;;  %v956_v57 = vadd.f32 1.0, %v1613_v15  ;;  %v1615_v58 = vpop.eup %1614  ;;  %v1657_v48 = vld [vmem:[%s1735_s20 + $0x28] sm:$0xff]  ;;  %v1659_v15 = vld [vmem:[%s1735_s20 + $0x58] sm:$0xff] }
 0x3ac   : > { %v1617_v60 = vpop.eup %1616  ;;  %v953_v33 = vadd.f32 1.0, %v1615_v58  ;;  %v1660_v58 = vld [vmem:[%s1735_s20 + $0x40] sm:$0xff] }
 0x3ad   : > { %1632 = vrcp.f32 %v956_v57  ;;  %v998_v63 = vmul.f32 %v1617_v60, %v1987_v17  ;;  %v1661_v60 = vld [vmem:[%s1735_s20 + $0x48] sm:$0xff] }
 0x3ae   : > { %v1619_v61 = vpop.eup %1618  ;;  %1634 = vpow2.f32 %v1263_v54  ;;  %1021 = vperm.xlu1 %1520, %v995_v59  }
 0x3af   : > { %v1621_v62 = vpop.eup %1620  ;;  %1636 = vrcp.f32 %v951_v20  ;;  %v958_v44 = vadd.f32 1.0, %v1619_v61 }
 0x3b0   : > { %v1623_v7 = vpop.eup %1622  ;;  %v955_v0 = vadd.f32 1.0, %v1621_v62  ;;  %v1662_v62 = vld [vmem:[%s1735_s20 + $0x90] sm:$0xff] }
 0x3b1   : > { %1638 = vrcp.f32 %v958_v44  ;;  %v1625_v4 = vpop.eup %1624  ;;  %v997_v42 = vmul.f32 %v1623_v7, %v1989_v28  ;;  %v1663_v44 = vld [vmem:[%s1735_s20 + $0x98] sm:$0xff] }
 0x3b2   : > { %1036 = vperm.xlu1 %1520, %v998_v63   ;;  %1640 = vrcp.f32 %v953_v33  ;;  %v957_v19 = vadd.f32 1.0, %v1625_v4 }
 0x3b3   : > { %v1627_v1 = vpop.eup %1626  ;;  %1642 = vrcp.f32 %v955_v0  ;;  %v1664_v0 = vld [vmem:[%s1735_s20 + $0x70] sm:$0xff] }
 0x3b4   : > { %v1629_v5 = vpop.eup %1628  ;;  %v1002_v8 = vmul.f32 %v1627_v1, %v1998_v56 }
 0x3b5   : > { %v1631_v12 = vpop.eup %1630  ;;  %v960_v13 = vadd.f32 1.0, %v1629_v5  ;;  %v1665_v5 = vld [vmem:[%s1735_s20 + $0x78] sm:$0xff] }
 0x3b6   : > { %1031 = vperm.xlu1 %1520, %v997_v42   ;;  %1056 = vperm.xlu0 %1521, %v1002_v8   ;;  %v1000_v21 = vmul.f32 %v1631_v12, %v1993_v49  ;;  %v1666_v8 = vld [vmem:[%s1735_s20 + $0xb0] sm:$0xff] }
 0x3b7   : > { %v1633_v18 = vpop.eup %1632  ;;  %1644 = vrcp.f32 %v960_v13  ;;  %v1667_v13 = vld [vmem:[%s1735_s20 + $0xb8] sm:$0xff] }
 0x3b8   : > { %v1635_v17 = vpop.eup %1634  ;;  %v1004_v24 = vmul.f32 %v1633_v18, %v2004_v2  ;;  %1646 = vrcp.f32 %v957_v19 }
 0x3b9   : > { %v1637_v25 = vpop.eup %1636  ;;  %v959_v28 = vadd.f32 1.0, %v1635_v17 }
 0x3ba   : > { %1046 = vperm.xlu1 %1520, %v1000_v21   ;;  %1066 = vperm.xlu0 %1521, %v1004_v24   ;;  %v999_v56 = vmul.f32 %v1637_v25, %v1996_v55  ;;  %v1668_v21 = vld [vmem:[%s1735_s20 + $0x60] sm:$0xff]  ;;  %v1669_v25 = vld [vmem:[%s1735_s20 + $0x68] sm:$0xff] }
 0x3bb   : > { %v1639_v30 = vpop.eup %1638  ;;  %1648 = vrcp.f32 %v959_v28  ;;  %v1670_v28 = vld [vmem:[%s1735_s20 + $0xd0] sm:$0xff] }
 0x3bc   : > { %v1006_v31 = vmul.f32 %v1639_v30, %v2010_v9  ;;  %v1641_v32 = vpop.eup %1640 }
 0x3bd   : > { %v1643_v36 = vpop.eup %1642  ;;  %v1001_v49 = vmul.f32 %v1641_v32, %v2002_v3 }
 0x3be   : > { %1041 = vperm.xlu1 %1520, %v999_v56   ;;  %1076 = vperm.xlu0 %1521, %v1006_v31   ;;  %v1003_v55 = vmul.f32 %v1643_v36, %v2008_v6  ;;  %v1650_v6 = vld [vmem:[%s1735_s20 + $0x10] sm:$0xff]  ;;  %v1671_v31 = vld [vmem:[%s1735_s20 + $0xd8] sm:$0xff] }
 0x3c1   : > { %v1645_v2 = vpop.eup %1644 }
 0x3c2   : > { %1051 = vperm.xlu1 %1520, %v1001_v49   ;;  %v1008_v37 = vmul.f32 %v1645_v2, %v2017_v26  ;;  %v1647_v38 = vpop.eup %1646  ;;  %v1651_v26 = vld [vmem:[%s1735_s20 + $0x18] sm:$0xff]  ;;  %v1672_v49 = vld [vmem:[%s1735_s20 + $0x80] sm:$0xff] }
 0x3c3   : > { %v1005_v9 = vmul.f32 %v1647_v38, %v2014_v14 }
 0x3c4   : > { %1086 = vperm.xlu0 %1521, %v1008_v37   ;;  %v1673_v37 = vld [vmem:[%s1735_s20 + $0x88] sm:$0xff] }
 0x3c5   : > { %v1649_v39 = vpop.eup %1648 }
 0x3c6   : > { %1061 = vperm.xlu1 %1520, %v1003_v55   ;;  %v1007_v43 = vmul.f32 %v1649_v39, %v2019_v27 }
 0x3ca   : > { %1071 = vperm.xlu1 %1520, %v1005_v9   ;;  %v1674_v9 = vld [vmem:[%s1735_s20 + $0xf0] sm:$0xff] }
 0x3ce   : > { %1081 = vperm.xlu1 %1520, %v1007_v43   ;;  %v1675_v43 = vld [vmem:[%s1735_s20 + $0xf8] sm:$0xff] }
 0x425   : > { %v1017_v3 = vpop.permute.xlu1 %1016 }
 0x426   : > { %v1091_v14 = vmul.f32 %v1650_v6, %v1017_v3  ;;  %v1092_v45 = vmul.f32 %v1651_v26, %v1017_v3  ;;  %v1012_v27 = vpop.permute.xlu0 %1011 }
 0x427   : > { %v1089_v10 = vmul.f32 %v1652_v46, %v1012_v27  ;;  %v1090_v16 = vmul.f32 %v1653_v11, %v1012_v27 }
 0x428   : > { %1123 = vst [vmem:[%s2089_s23 + $0x10] sm:$0xff] %v1091_v14  ;;  %1124 = vst [vmem:[%s2089_s23 + $0x18] sm:$0xff] %v1092_v45  ;;  %v1676_v14 = vld [vmem:[%s1735_s20 + $0xa0] sm:$0xff]  ;;  %v1677_v45 = vld [vmem:[%s1735_s20 + $0xa8] sm:$0xff] }
 0x429   : > { %1121 = vst [vmem:[%s2089_s23] sm:$0xff] %v1089_v10  ;;  %1122 = vst [vmem:[%s2089_s23 + $0x8] sm:$0xff] %v1090_v16  ;;  %v1027_v22 = vpop.permute.xlu1 %1026  ;;  %v1678_v10 = vld [vmem:[%s1735_s20 + $0xc0] sm:$0xff]  ;;  %v1679_v16 = vld [vmem:[%s1735_s20 + $0xc8] sm:$0xff] }
 0x42a   : > { %v1095_v29 = vmul.f32 %v1654_v23, %v1027_v22  ;;  %v1096_v35 = vmul.f32 %v1655_v34, %v1027_v22 }
 0x42c   : > { %1127 = vst [vmem:[%s2089_s23 + $0x30] sm:$0xff] %v1095_v29  ;;  %1128 = vst [vmem:[%s2089_s23 + $0x38] sm:$0xff] %v1096_v35  ;;  %v1680_v29 = vld [vmem:[%s1735_s20 + $0xe0] sm:$0xff]  ;;  %v1681_v35 = vld [vmem:[%s1735_s20 + $0xe8] sm:$0xff] }
 0x42d   : > { %v1022_v40 = vpop.permute.xlu1 %1021 }
 0x42e   : > { %v1093_v47 = vmul.f32 %v1656_v41, %v1022_v40  ;;  %v1094_v50 = vmul.f32 %v1657_v48, %v1022_v40 }
 0x430   : > { %1125 = vst [vmem:[%s2089_s23 + $0x20] sm:$0xff] %v1093_v47  ;;  %1126 = vst [vmem:[%s2089_s23 + $0x28] sm:$0xff] %v1094_v50 }
 0x431   : > { %v1037_v51 = vpop.permute.xlu1 %1036 }
 0x432   : > { %v1099_v53 = vmul.f32 %v1658_v52, %v1037_v51  ;;  %v1100_v54 = vmul.f32 %v1659_v15, %v1037_v51 }
 0x434   : > { %1131 = vst [vmem:[%s2089_s23 + $0x50] sm:$0xff] %v1099_v53  ;;  %1132 = vst [vmem:[%s2089_s23 + $0x58] sm:$0xff] %v1100_v54 }
 0x435   : > { %v1032_v20 = vpop.permute.xlu1 %1031  ;;  %v1057_v57 = vpop.permute.xlu0 %1056 }
 0x436   : > { %v1097_v59 = vmul.f32 %v1660_v58, %v1032_v20  ;;  %v1098_v61 = vmul.f32 %v1661_v60, %v1032_v20  ;;  %v1107_v33 = vmul.f32 %v1662_v62, %v1057_v57  ;;  %v1108_v63 = vmul.f32 %v1663_v44, %v1057_v57 }
 0x438   : > { %1129 = vst [vmem:[%s2089_s23 + $0x40] sm:$0xff] %v1097_v59  ;;  %1130 = vst [vmem:[%s2089_s23 + $0x48] sm:$0xff] %v1098_v61 }
 0x439   : > { %1139 = vst [vmem:[%s2089_s23 + $0x90] sm:$0xff] %v1107_v33  ;;  %1140 = vst [vmem:[%s2089_s23 + $0x98] sm:$0xff] %v1108_v63  ;;  %v1047_v7 = vpop.permute.xlu1 %1046  ;;  %v1067_v4 = vpop.permute.xlu0 %1066 }
 0x43a   : > { %v1103_v1 = vmul.f32 %v1664_v0, %v1047_v7  ;;  %v1104_v42 = vmul.f32 %v1665_v5, %v1047_v7  ;;  %v1111_v12 = vmul.f32 %v1666_v8, %v1067_v4  ;;  %v1112_v18 = vmul.f32 %v1667_v13, %v1067_v4 }
 0x43c   : > { %1135 = vst [vmem:[%s2089_s23 + $0x70] sm:$0xff] %v1103_v1  ;;  %1136 = vst [vmem:[%s2089_s23 + $0x78] sm:$0xff] %v1104_v42 }
 0x43d   : > { %1143 = vst [vmem:[%s2089_s23 + $0xb0] sm:$0xff] %v1111_v12  ;;  %1144 = vst [vmem:[%s2089_s23 + $0xb8] sm:$0xff] %v1112_v18  ;;  %v1042_v19 = vpop.permute.xlu1 %1041  ;;  %v1077_v17 = vpop.permute.xlu0 %1076 }
 0x43e   : > { %v1101_v24 = vmul.f32 %v1668_v21, %v1042_v19  ;;  %v1102_v30 = vmul.f32 %v1669_v25, %v1042_v19  ;;  %v1115_v56 = vmul.f32 %v1670_v28, %v1077_v17  ;;  %v1116_v32 = vmul.f32 %v1671_v31, %v1077_v17 }
 0x440   : > { %1133 = vst [vmem:[%s2089_s23 + $0x60] sm:$0xff] %v1101_v24  ;;  %1134 = vst [vmem:[%s2089_s23 + $0x68] sm:$0xff] %v1102_v30 }
 0x441   : > { %1147 = vst [vmem:[%s2089_s23 + $0xd0] sm:$0xff] %v1115_v56  ;;  %1148 = vst [vmem:[%s2089_s23 + $0xd8] sm:$0xff] %v1116_v32  ;;  %v1052_v36 = vpop.permute.xlu1 %1051 }
 0x442   : > { %v1105_v2 = vmul.f32 %v1672_v49, %v1052_v36  ;;  %v1106_v55 = vmul.f32 %v1673_v37, %v1052_v36 }
 0x443   : > { %v1087_v38 = vpop.permute.xlu0 %1086 }
 0x444   : > { %1137 = vst [vmem:[%s2089_s23 + $0x80] sm:$0xff] %v1105_v2  ;;  %1138 = vst [vmem:[%s2089_s23 + $0x88] sm:$0xff] %v1106_v55  ;;  %v1119_v39 = vmul.f32 %v1674_v9, %v1087_v38  ;;  %v1120_v3 = vmul.f32 %v1675_v43, %v1087_v38 }
 0x445   : > { %v1062_v6 = vpop.permute.xlu1 %1061 }
 0x446   : > { %1151 = vst [vmem:[%s2089_s23 + $0xf0] sm:$0xff] %v1119_v39  ;;  %1152 = vst [vmem:[%s2089_s23 + $0xf8] sm:$0xff] %v1120_v3  ;;  %v1109_v26 = vmul.f32 %v1676_v14, %v1062_v6  ;;  %v1110_v27 = vmul.f32 %v1677_v45, %v1062_v6 }
 0x448   : > { %1141 = vst [vmem:[%s2089_s23 + $0xa0] sm:$0xff] %v1109_v26  ;;  %1142 = vst [vmem:[%s2089_s23 + $0xa8] sm:$0xff] %v1110_v27 }
 0x449   : > { %v1072_v46 = vpop.permute.xlu1 %1071 }
 0x44a   : > { %v1113_v11 = vmul.f32 %v1678_v10, %v1072_v46  ;;  %v1114_v22 = vmul.f32 %v1679_v16, %v1072_v46 }
 0x44c   : > { %1145 = vst [vmem:[%s2089_s23 + $0xc0] sm:$0xff] %v1113_v11  ;;  %1146 = vst [vmem:[%s2089_s23 + $0xc8] sm:$0xff] %v1114_v22 }
 0x44d   : > { %v1082_v23 = vpop.permute.xlu1 %1081 }
 0x44e   : > { %v1117_v34 = vmul.f32 %v1680_v29, %v1082_v23  ;;  %v1118_v40 = vmul.f32 %v1681_v35, %v1082_v23 }
 0x450   : > { %1149 = vst [vmem:[%s2089_s23 + $0xe0] sm:$0xff] %v1117_v34  ;;  %1150 = vst [vmem:[%s2089_s23 + $0xe8] sm:$0xff] %v1118_v40 }
 0x451 PF: > { %s14_s15 = sadd.s32 1, %s1688_s15  }
 0x452   : > { %p11_p4 = scmp.ge.s32.totalorder %s14_s15, 4  }
 0x454   :  { %13 = sbr.rel (!%p11_p4) target bundleno = 1 (0x1), region = 66 }

</bundles_post_ra>
